<compile_context>
chip_gen: v6e
topology: v6e:2x2x1
jax: 0.10.0
libtpu: 0.0.40
codegen_flags: <defaults>
</compile_context>

<pallas_src>
import functools

import jax
import jax.numpy as jnp
from jax.experimental import pallas as pl
from jax.experimental.pallas import tpu as pltpu


def _yield_scoring_kernel(use_domain,
                          x_ref, dom_ref, w_ref, bg_ref, ws_ref, wd_ref,
                          pool_ref, bs_ref, bd_ref, wf_ref, bf_ref,
                          out_ref):
    # x_ref:   (TB*N, K) bf16   fused [local | global | binary] features
    # w_ref:   (K, H)    bf16   fused [wl; wg; wb] (pre-transposed)
    # bg_ref:  (1, H)    f32    fcglobal bias
    # ws_ref:  (1, H)    f32    fcscore weight (row)
    # wd_ref:  (1, Ddm)  f32    domain weight (row)
    # pool_ref:(TB, TB*N) f32   block-diagonal 1/N pooling matrix
    # bs/bd/wf/bf: SMEM scalars
    # out_ref: (TB, 1)   f32

    # Single fused projection (one MXU matmul, f32 accumulation) + bias + relu.
    feats = jnp.dot(x_ref[...], w_ref[...],
                    preferred_element_type=jnp.float32)          # (TB*N, H)
    feats = jnp.maximum(feats + bg_ref[...], 0.0)

    # fcscore: width-1 projection on the VPU + lane reduction (no MXU).
    score_g = jnp.sum(feats * ws_ref[...], axis=-1, keepdims=True) + bs_ref[0]
    abs_score = jnp.abs(score_g)                                  # (TB*N, 1)

    # mean(|score|) over the node axis, per batch row, via 1/N pooling matmul.
    score_g_avg = jnp.dot(pool_ref[...], abs_score,
                          preferred_element_type=jnp.float32)     # (TB, 1)

    if use_domain:
        dom = dom_ref[...]                                        # (TB, Ddm)
        score_d = jnp.sum(dom * wd_ref[...], axis=-1, keepdims=True) + bd_ref[0]
        score_d_avg = jnp.abs(score_d)                            # (TB, 1)
        # finalscore(cat([score_d_avg, score_g_avg], dim=1))
        out_ref[...] = (score_d_avg * wf_ref[0]
                        + score_g_avg * wf_ref[1]
                        + bf_ref[0])
    else:
        out_ref[...] = score_g_avg


def yield_scoring(local_features, global_features, binary, sparse_idx,
                  domain_feats, params, use_domain="rdkit", tb=8):
    del sparse_idx  # unused by the reference forward pass
    B, N, H = global_features.shape
    l1, l2, l3, l4 = binary.shape
    Dbin = l3 * l4
    Ddm = domain_feats.shape[1]
    K = 2 * H + Dbin

    rows = tb * N
    assert rows % 8 == 0, "tb * N must be a multiple of 8 (ideally 128/256)"

    # Pad the batch to a multiple of the batch tile.
    B_pad = ((B + tb - 1) // tb) * tb
    pad_b = B_pad - B

    # Fused input: [local | global | binary(zero-padded over the node axis)].
    # Padding binary with zeros is exact since fcbinary has no bias.
    binary_flat = binary.reshape(l1, l2, Dbin)
    binary_pad = jnp.pad(binary_flat, ((0, 0), (0, N - l2), (0, 0)))
    x = jnp.concatenate([local_features, global_features, binary_pad],
                        axis=-1).astype(jnp.bfloat16)             # (B, N, K)
    if pad_b:
        x = jnp.pad(x, ((0, pad_b), (0, 0), (0, 0)))
    x2 = x.reshape(B_pad * N, K)                                  # (B_pad*N, K)

    dom = domain_feats.astype(jnp.float32)
    if pad_b:
        dom = jnp.pad(dom, ((0, pad_b), (0, 0)))

    # Fused weight [wl; wg; wb] -> (K, H), matching the concat order above.
    w_cat = jnp.concatenate([params["fclocal_w"].T,
                             params["fcglobal_w"].T,
                             params["fcbinary_w"].T],
                            axis=0).astype(jnp.bfloat16)          # (K, H)
    bg = params["fcglobal_b"].reshape(1, H).astype(jnp.float32)
    ws_row = params["fcscore_w"].reshape(1, H).astype(jnp.float32)
    wd_row = params["domain_w"].reshape(1, Ddm).astype(jnp.float32)
    bs = params["fcscore_b"].reshape(1).astype(jnp.float32)
    bd = params["domain_b"].reshape(1).astype(jnp.float32)
    wf = params["finalscore_w"].reshape(2).astype(jnp.float32)
    bf = params["finalscore_b"].reshape(1).astype(jnp.float32)

    # Block-diagonal pooling matrix: pool[j, j*N:(j+1)*N] = 1/N.
    pool = jnp.repeat(jnp.eye(tb, dtype=jnp.float32), N, axis=1) / N  # (tb, rows)

    use_dom = use_domain in ("rdkit", "no_rdkit")
    kernel = functools.partial(_yield_scoring_kernel, use_dom)

    smem = pl.BlockSpec(memory_space=pltpu.MemorySpace.SMEM)

    out = pl.pallas_call(
        kernel,
        out_shape=jax.ShapeDtypeStruct((B_pad, 1), jnp.float32),
        grid_spec=pltpu.PrefetchScalarGridSpec(
            num_scalar_prefetch=0,
            grid=(B_pad // tb,),
            in_specs=[
                pl.BlockSpec((rows, K), lambda t: (t, 0)),     # fused features
                pl.BlockSpec((tb, Ddm), lambda t: (t, 0)),     # domain feats
                pl.BlockSpec((K, H), lambda t: (0, 0)),        # fused weight (resident)
                pl.BlockSpec((1, H), lambda t: (0, 0)),        # bg
                pl.BlockSpec((1, H), lambda t: (0, 0)),        # ws
                pl.BlockSpec((1, Ddm), lambda t: (0, 0)),      # wd
                pl.BlockSpec((tb, rows), lambda t: (0, 0)),    # pooling matrix
                smem,                                          # bs
                smem,                                          # bd
                smem,                                          # wf
                smem,                                          # bf
            ],
            out_specs=pl.BlockSpec((tb, 1), lambda t: (t, 0)),
        ),
        compiler_params=pltpu.CompilerParams(
            dimension_semantics=("parallel",)),
    )(x2, dom, w_cat, bg, ws_row, wd_row, pool, bs, bd, wf, bf)
    return out[:B]


def yield_scoring_ref(local_features, global_features, binary, domain_feats,
                      params, use_domain="rdkit"):
    """Pure-JAX reference mirroring the torch forward pass."""
    B, N, H = global_features.shape
    l1, l2, l3, l4 = binary.shape
    g = global_features @ params["fcglobal_w"].T + params["fcglobal_b"]
    l = local_features @ params["fclocal_w"].T
    bfe = binary.reshape(l1, l2, l3 * l4) @ params["fcbinary_w"].T
    bfe = jnp.pad(bfe, ((0, 0), (0, N - l2), (0, 0)))
    feats = jax.nn.relu(g + l + bfe)
    score_g = feats @ params["fcscore_w"].T + params["fcscore_b"]
    score_g_avg = jnp.mean(jnp.abs(score_g), axis=1)
    if use_domain in ("rdkit", "no_rdkit"):
        score_d = domain_feats @ params["domain_w"].T + params["domain_b"]
        score_d_avg = jnp.abs(score_d)
        cat = jnp.concatenate([score_d_avg, score_g_avg], axis=1)
        return cat @ params["finalscore_w"].T + params["finalscore_b"]
    return score_g_avg


def _bf16_round(x):
    return x.astype(jnp.bfloat16).astype(jnp.float32)


if __name__ == "__main__":
    B, N, H = 16, 16, 32         # batch, nodes (d2), hidden_size
    L2, L3, L4 = 8, 8, 4         # binary dims (binary_size = L3*L4 = 32)
    Dbin = L3 * L4
    Ddm = 16                     # dmfeats_size
    TB = 8                       # batch rows per grid step -> TB*N = 128

    key = jax.random.PRNGKey(0)
    keys = jax.random.split(key, 16)
    s = 0.1
    params = {
        "fclocal_w":    jax.random.normal(keys[0], (H, H), jnp.float32) * s,
        "fcglobal_w":   jax.random.normal(keys[1], (H, H), jnp.float32) * s,
        "fcglobal_b":   jax.random.normal(keys[2], (H,), jnp.float32) * s,
        "fcbinary_w":   jax.random.normal(keys[3], (H, Dbin), jnp.float32) * s,
        "fcscore_w":    jax.random.normal(keys[4], (1, H), jnp.float32) * s,
        "fcscore_b":    jax.random.normal(keys[5], (1,), jnp.float32) * s,
        "domain_w":     jax.random.normal(keys[6], (1, Ddm), jnp.float32) * s,
        "domain_b":     jax.random.normal(keys[7], (1,), jnp.float32) * s,
        "finalscore_w": jax.random.normal(keys[8], (1, 2), jnp.float32) * s,
        "finalscore_b": jax.random.normal(keys[9], (1,), jnp.float32) * s,
    }

    local_features = jax.random.normal(keys[10], (B, N, H), jnp.float32)
    global_features = jax.random.normal(keys[11], (B, N, H), jnp.float32)
    binary = jax.random.normal(keys[12], (B, L2, L3, L4), jnp.float32)
    domain_feats = jax.random.normal(keys[13], (B, Ddm), jnp.float32)
    sparse_idx = jnp.zeros((B,), jnp.int32)  # unused by forward, mirrors torch signature

    # Reference that matches the kernel's bf16 inputs for the fused matmul
    # (bf16 x bf16 -> f32 products are exact, so this is a tight comparison).
    params_bf16 = dict(params)
    for k in ("fclocal_w", "fcglobal_w", "fcbinary_w"):
        params_bf16[k] = _bf16_round(params[k])
    loc_b = _bf16_round(local_features)
    glo_b = _bf16_round(global_features)
    bin_b = _bf16_round(binary)

    # --- with domain features (use_domain = "rdkit") ---
    out = yield_scoring(local_features, global_features, binary, sparse_idx,
                        domain_feats, params, use_domain="rdkit", tb=TB)
    out = jax.block_until_ready(out)
    assert out.shape == (B, 1), out.shape

    ref_bf16 = yield_scoring_ref(loc_b, glo_b, bin_b, domain_feats,
                                 params_bf16, use_domain="rdkit")
    ref_f32 = yield_scoring_ref(local_features, global_features, binary,
                                domain_feats, params, use_domain="rdkit")
    assert jnp.allclose(out, ref_bf16, atol=1e-4, rtol=1e-4), (out, ref_bf16)
    assert jnp.allclose(out, ref_f32, atol=1e-2, rtol=1e-2), (out, ref_f32)

    # --- without domain features ---
    out_nd = yield_scoring(local_features, global_features, binary, sparse_idx,
                           domain_feats, params, use_domain="none", tb=TB)
    out_nd = jax.block_until_ready(out_nd)
    ref_nd = yield_scoring_ref(loc_b, glo_b, bin_b, domain_feats,
                               params_bf16, use_domain="none")
    assert out_nd.shape == (B, 1), out_nd.shape
    assert jnp.allclose(out_nd, ref_nd, atol=1e-4, rtol=1e-4), (out_nd, ref_nd)

    print("KERNEL_OK")
</pallas_src>

<mosaic_0001>
module attributes {stable_mosaic.version = 11 : i64} {
  func.func @_yield_scoring_kernel(%arg0: i32, %arg1: memref<128x96xbf16, #tpu.memory_space<vmem>>, %arg2: memref<8x16xf32, #tpu.memory_space<vmem>>, %arg3: memref<96x32xbf16, #tpu.memory_space<vmem>>, %arg4: memref<1x32xf32, #tpu.memory_space<vmem>>, %arg5: memref<1x32xf32, #tpu.memory_space<vmem>>, %arg6: memref<1x16xf32, #tpu.memory_space<vmem>>, %arg7: memref<8x128xf32, #tpu.memory_space<vmem>>, %arg8: memref<1xf32, #tpu.memory_space<smem>>, %arg9: memref<1xf32, #tpu.memory_space<smem>>, %arg10: memref<2xf32, #tpu.memory_space<smem>>, %arg11: memref<1xf32, #tpu.memory_space<smem>>, %arg12: memref<8x1xf32, #tpu.memory_space<vmem>>) attributes {dimension_semantics = [#tpu.dimension_semantics<parallel>], iteration_bounds = array<i64: 2>, scalar_prefetch = 0 : i64, scratch_operands = 0 : i64, tpu.core_type = #tpu.core_type<tc>, window_params = [{transform_indices = @transform_0, window_bounds = array<i64: 128, 96>}, {transform_indices = @transform_1, window_bounds = array<i64: 8, 16>}, {pipeline_mode = #tpu.pipeline_mode<synchronous>, transform_indices = @transform_2, window_bounds = array<i64: 96, 32>}, {pipeline_mode = #tpu.pipeline_mode<synchronous>, transform_indices = @transform_3, window_bounds = array<i64: 1, 32>}, {pipeline_mode = #tpu.pipeline_mode<synchronous>, transform_indices = @transform_4, window_bounds = array<i64: 1, 32>}, {pipeline_mode = #tpu.pipeline_mode<synchronous>, transform_indices = @transform_5, window_bounds = array<i64: 1, 16>}, {pipeline_mode = #tpu.pipeline_mode<synchronous>, transform_indices = @transform_6, window_bounds = array<i64: 8, 128>}, {transform_indices = @transform_7, window_bounds = array<i64: 1>}, {transform_indices = @transform_8, window_bounds = array<i64: 1>}, {transform_indices = @transform_9, window_bounds = array<i64: 2>}, {transform_indices = @transform_10, window_bounds = array<i64: 1>}, {transform_indices = @transform_11, window_bounds = array<i64: 8, 1>}]} {
    %c0 = arith.constant 0 : index
    %c0_0 = arith.constant 0 : index
    %0 = vector.load %arg1[%c0, %c0_0] : memref<128x96xbf16, #tpu.memory_space<vmem>>, vector<128x96xbf16>
    %c0_1 = arith.constant 0 : index
    %c0_2 = arith.constant 0 : index
    %1 = vector.load %arg3[%c0_1, %c0_2] : memref<96x32xbf16, #tpu.memory_space<vmem>>, vector<96x32xbf16>
    %cst = arith.constant dense<0.000000e+00> : vector<128x32xf32>
    %2 = tpu.matmul %0, %1, %cst {dimension_numbers = #tpu.dot_dimension_numbers<[1], [0], [0], [1], [0, 0, 1, 1], [], []>} : vector<128x96xbf16>, vector<96x32xbf16>, vector<128x32xf32> -> vector<128x32xf32>
    %c0_3 = arith.constant 0 : index
    %c0_4 = arith.constant 0 : index
    %3 = vector.load %arg4[%c0_3, %c0_4] : memref<1x32xf32, #tpu.memory_space<vmem>>, vector<1x32xf32>
    %4 = vector.broadcast %3 : vector<1x32xf32> to vector<128x32xf32>
    %5 = arith.addf %2, %4 : vector<128x32xf32>
    %cst_5 = arith.constant 0.000000e+00 : f32
    %6 = vector.broadcast %cst_5 : f32 to vector<128x32xf32>
    %7 = arith.maximumf %5, %6 : vector<128x32xf32>
    %c0_6 = arith.constant 0 : index
    %c0_7 = arith.constant 0 : index
    %8 = vector.load %arg5[%c0_6, %c0_7] : memref<1x32xf32, #tpu.memory_space<vmem>>, vector<1x32xf32>
    %9 = vector.broadcast %8 : vector<1x32xf32> to vector<128x32xf32>
    %10 = arith.mulf %7, %9 : vector<128x32xf32>
    %cst_8 = arith.constant dense<0.000000e+00> : vector<128xf32>
    %11 = vector.multi_reduction <add>, %10, %cst_8 [1] : vector<128x32xf32> to vector<128xf32>
    %12 = vector.shape_cast %11 : vector<128xf32> to vector<128x1xf32>
    %c0_9 = arith.constant 0 : index
    %13 = memref.load %arg8[%c0_9] : memref<1xf32, #tpu.memory_space<smem>>
    %14 = vector.broadcast %13 : f32 to vector<128x1xf32>
    %15 = arith.addf %12, %14 : vector<128x1xf32>
    %16 = math.absf %15 : vector<128x1xf32>
    %c0_10 = arith.constant 0 : index
    %c0_11 = arith.constant 0 : index
    %17 = vector.load %arg7[%c0_10, %c0_11] : memref<8x128xf32, #tpu.memory_space<vmem>>, vector<8x128xf32>
    %cst_12 = arith.constant dense<0.000000e+00> : vector<8x1xf32>
    %18 = tpu.matmul %17, %16, %cst_12 {dimension_numbers = #tpu.dot_dimension_numbers<[1], [0], [0], [1], [0, 0, 1, 1], [], []>} : vector<8x128xf32>, vector<128x1xf32>, vector<8x1xf32> -> vector<8x1xf32>
    %c0_13 = arith.constant 0 : index
    %c0_14 = arith.constant 0 : index
    %19 = vector.load %arg2[%c0_13, %c0_14] : memref<8x16xf32, #tpu.memory_space<vmem>>, vector<8x16xf32>
    %c0_15 = arith.constant 0 : index
    %c0_16 = arith.constant 0 : index
    %20 = vector.load %arg6[%c0_15, %c0_16] : memref<1x16xf32, #tpu.memory_space<vmem>>, vector<1x16xf32>
    %21 = vector.broadcast %20 : vector<1x16xf32> to vector<8x16xf32>
    %22 = arith.mulf %19, %21 : vector<8x16xf32>
    %cst_17 = arith.constant dense<0.000000e+00> : vector<8xf32>
    %23 = vector.multi_reduction <add>, %22, %cst_17 [1] : vector<8x16xf32> to vector<8xf32>
    %24 = vector.shape_cast %23 : vector<8xf32> to vector<8x1xf32>
    %c0_18 = arith.constant 0 : index
    %25 = memref.load %arg9[%c0_18] : memref<1xf32, #tpu.memory_space<smem>>
    %26 = vector.broadcast %25 : f32 to vector<8x1xf32>
    %27 = arith.addf %24, %26 : vector<8x1xf32>
    %28 = math.absf %27 : vector<8x1xf32>
    %c0_19 = arith.constant 0 : index
    %29 = memref.load %arg10[%c0_19] : memref<2xf32, #tpu.memory_space<smem>>
    %30 = vector.broadcast %29 : f32 to vector<8x1xf32>
    %31 = arith.mulf %28, %30 : vector<8x1xf32>
    %c1 = arith.constant 1 : index
    %32 = memref.load %arg10[%c1] : memref<2xf32, #tpu.memory_space<smem>>
    %33 = vector.broadcast %32 : f32 to vector<8x1xf32>
    %34 = arith.mulf %18, %33 : vector<8x1xf32>
    %35 = arith.addf %31, %34 : vector<8x1xf32>
    %c0_20 = arith.constant 0 : index
    %36 = memref.load %arg11[%c0_20] : memref<1xf32, #tpu.memory_space<smem>>
    %37 = vector.broadcast %36 : f32 to vector<8x1xf32>
    %38 = arith.addf %35, %37 : vector<8x1xf32>
    %c0_21 = arith.constant 0 : index
    %c0_22 = arith.constant 0 : index
    %39 = vector.load %arg12[%c0_21, %c0_22] : memref<8x1xf32, #tpu.memory_space<vmem>>, vector<8x1xf32>
    tpu.vector_store %arg12[%c0_21, %c0_22], %38 {strides = array<i32>} : memref<8x1xf32, #tpu.memory_space<vmem>>, vector<8x1xf32>,
    return
  }
  func.func @transform_0(%arg0: i32) -> (i32, i32) {
    %c0_i32 = arith.constant 0 : i32
    %c0_i32_0 = arith.constant 0 : i32
    return %arg0, %c0_i32 : i32, i32
  }
  func.func @transform_1(%arg0: i32) -> (i32, i32) {
    %c0_i32 = arith.constant 0 : i32
    %c0_i32_0 = arith.constant 0 : i32
    return %arg0, %c0_i32 : i32, i32
  }
  func.func @transform_2(%arg0: i32) -> (i32, i32) {
    %c0_i32 = arith.constant 0 : i32
    %c0_i32_0 = arith.constant 0 : i32
    %c0_i32_1 = arith.constant 0 : i32
    return %c0_i32, %c0_i32_0 : i32, i32
  }
  func.func @transform_3(%arg0: i32) -> (i32, i32) {
    %c0_i32 = arith.constant 0 : i32
    %c0_i32_0 = arith.constant 0 : i32
    %c0_i32_1 = arith.constant 0 : i32
    return %c0_i32, %c0_i32_0 : i32, i32
  }
  func.func @transform_4(%arg0: i32) -> (i32, i32) {
    %c0_i32 = arith.constant 0 : i32
    %c0_i32_0 = arith.constant 0 : i32
    %c0_i32_1 = arith.constant 0 : i32
    return %c0_i32, %c0_i32_0 : i32, i32
  }
  func.func @transform_5(%arg0: i32) -> (i32, i32) {
    %c0_i32 = arith.constant 0 : i32
    %c0_i32_0 = arith.constant 0 : i32
    %c0_i32_1 = arith.constant 0 : i32
    return %c0_i32, %c0_i32_0 : i32, i32
  }
  func.func @transform_6(%arg0: i32) -> (i32, i32) {
    %c0_i32 = arith.constant 0 : i32
    %c0_i32_0 = arith.constant 0 : i32
    %c0_i32_1 = arith.constant 0 : i32
    return %c0_i32, %c0_i32_0 : i32, i32
  }
  func.func @transform_7(%arg0: i32) -> i32 {
    %c0_i32 = arith.constant 0 : i32
    %c0_i32_0 = arith.constant 0 : i32
    return %c0_i32 : i32
  }
  func.func @transform_8(%arg0: i32) -> i32 {
    %c0_i32 = arith.constant 0 : i32
    %c0_i32_0 = arith.constant 0 : i32
    return %c0_i32 : i32
  }
  func.func @transform_9(%arg0: i32) -> i32 {
    %c0_i32 = arith.constant 0 : i32
    %c0_i32_0 = arith.constant 0 : i32
    return %c0_i32 : i32
  }
  func.func @transform_10(%arg0: i32) -> i32 {
    %c0_i32 = arith.constant 0 : i32
    %c0_i32_0 = arith.constant 0 : i32
    return %c0_i32 : i32
  }
  func.func @transform_11(%arg0: i32) -> (i32, i32) {
    %c0_i32 = arith.constant 0 : i32
    %c0_i32_0 = arith.constant 0 : i32
    return %arg0, %c0_i32 : i32, i32
  }
}

</mosaic_0001>

<bundles_post_ra>
// kernel: tpu_custom_call.1
= control target key start
LH: loop header
LB: loop body
LE: loop exit
PB: predicated region body
PF: predicated region fallthrough
CT: control target
= control target key end

     0   :  { %s1405_s0 = inlined_call_operand.vmem [shape: bf16[256,96], index: 0, kind: input, shape index: {}]   ;;  %s1406_s1 = inlined_call_operand.vmem [shape: f32[16,16], index: 1, kind: input, shape index: {}]   ;;  %s1407_s2 = inlined_call_operand.vmem [shape: bf16[96,32], index: 2, kind: input, shape index: {}]   ;;  %s1408_s3 = inlined_call_operand.vmem [shape: f32[1,32], index: 3, kind: input, shape index: {}]   ;;  %s1409_s4 = inlined_call_operand.vmem [shape: f32[1,32], index: 4, kind: input, shape index: {}]   ;;  %s1410_s5 = inlined_call_operand.vmem [shape: f32[1,16], index: 5, kind: input, shape index: {}]   ;;  %s1411_s6 = inlined_call_operand.vmem [shape: f32[8,128], index: 6, kind: input, shape index: {}]   ;;  %s1412_s7 = inlined_call_operand.<no memory space> [shape: f32[1], index: 7, kind: input, shape index: {}]   ;;  %s1413_s8 = inlined_call_operand.<no memory space> [shape: f32[1], index: 8, kind: input, shape index: {}]   ;;  %s1414_s9 = inlined_call_operand.vmem [shape: f32[2], index: 9, kind: input, shape index: {}]   ;;  %s1415_s10 = inlined_call_operand.<no memory space> [shape: f32[1], index: 10, kind: input, shape index: {}]   ;;  %s1416_s11 = inlined_call_operand.vmem [shape: f32[16,1], index: 11, kind: output, shape index: {}]  }
   0x1   :  { %16 = sst [smem:[#allocation2]] %s1412_s7 }
   0x2   :  { %17 = sst [smem:[#allocation3]] %s1413_s8 }
   0x3   :  { %18 = sst [smem:[#allocation4]] %s1415_s10 }
   0x4   :  { %19 = vsyncpa [#allocation6], 0  ;;  %s1221_s23 = smov 0  }
   0x5 LB: > { %s1227_s7 = sadd.s32 4294967295, %s1147_s23   ;;  %p956_p0 = scmp.ge.s32.totalorder %s1147_s23, 1  ;;  %s1147_s23 = sphi %s1221_s23, %s25_s23  }
   0x6   : > { %p297_p1 = scmp.lt.s32.totalorder %s1147_s23, 3  ;;  %s331_s10 = sshll.u32 %s1414_s9, 4  ;;  %s332_s10 = int_to_ptr.vmem [resolvable:$true] %s331_s10 }
   0x7   : > { %p1095_p3 = scmp.eq.s32.totalorder %s1227_s7, 0  ;;  %s1122_s26 = scalar_lea.vmem %s332_s10, 16 }
   0x8   : > { %p1234_p2 = pnand %p956_p0, %p297_p1  ;;  %p1123_p6 = scmp.ne.s32.totalorder %s332_s10, %s1122_s26 }
   0x9   : > { %p1130_p10 = scmp.lt.s32.totalorder %s332_s10, %s332_s10  ;;  %p1131_p11 = scmp.lt.s32.totalorder %s1122_s26, %s1122_s26 }
   0xa   : > { %p1091_p4 = pneg %p1234_p2 }
   0xb   : > { %p1132_p12 = por %p1131_p11, %p1130_p10 }
   0xc   : > { %p1092_p5 = pnand %p1095_p3, %p1091_p4 }
   0xe   : > { %p1124_p7 = pneg %p1092_p5 }
  0x10   : > { %p1125_p8 = pnand %p1124_p7, %p1123_p6 }
  0x12   : > { %p1126_p9 = pneg %p1125_p8 }
  0x14   : > { %p1133_p13 = pnand %p1132_p12, %p1126_p9 }
  0x16   : > { %1136 = shalt.err (!%p1133_p13)
}
  0x17   : > { %s1149_s27 = smov [#allocation5]   ;;  %363 = sbr.rel (%p1234_p2) target bundleno = 659 (0x293), region = 64 }
  0x18   : > { %1094 = dma.vmem_to_smem (!%p1092_p5), %s332_s10, 16, %s1149_s27, [#allocation6]  }
  0x1c   : > { %1142 = dma.done.wait (%p1095_p3), [#allocation6], 16  }
  0x1d   : > { %1144 = vsyncadd (%p1095_p3), [#allocation6], 4294967280 }
  0x1e   : > { %369 = sfence }
  0x1f   : > { %v1108_v0 = vld [vmem:[%s1407_s2 + $0x28] sm:$0xff]   ;;  %s961_s30 = sshll.u32 %s1227_s7, 4  ;;  %v1109_v1 = vld [vmem:[%s1407_s2 + $0x20] sm:$0xff]   ;;  %v1110_v2 = vld [vmem:[%s1407_s2 + $0x18] sm:$0xff]   ;;  %vm533_vm0 = vcmask 785408   ;;  %vm694_vm1 = vcmask 261120  }
  0x20   : > { %p408_p0 = scmp.lt.s32.totalorder %s961_s30, 31  ;;  %1024 = vmatprep.subr.bf16.mxu0 %v1108_v0  ;;  %v1111_v4 = vld [vmem:[%s1407_s2 + $0x10] sm:$0xff]   ;;  %v1112_v5 = vld [vmem:[%s1407_s2 + $0x8] sm:$0xff]   ;;  %v1113_v6 = vld [vmem:[%s1407_s2] sm:$0xff]   ;;  %vm1151_vm2 = vmmov 0   ;;  %p413_p1 = scmp.lt.s32.totalorder %s1227_s7, 1 }
  0x21   : > { %1025 = vmatpush3.bf16.msra.mxu0 %v1108_v0  ;;  %v1288_v27 = vld [vmem:[%s1408_s3] ss:$0 sm:$0xff]  ;;  %vm857_vm3 = vcmask 130048   ;;  %s865_s20 = sld [smem:[#allocation5]]  ;;  %vm875_vm4 = vcmask 7168  }
  0x22   : > { %s1419_s30 = smov (!%p408_p0, %s961_s30), 31  ;;  %1026 = vmatprep.subr.bf16.mxu0 %v1109_v1  ;;  %v1298_v38 = vld [vmem:[%s1409_s4] ss:$0 sm:$0xff]  ;;  %s1421_s7 = smov (!%p413_p1, %s1227_s7), 1 }
  0x23   : > { %s962_s16 = sshll.u32 %s1419_s30, 2  ;;  %s963_s29 = sshll.u32 %s1421_s7, 3 }
  0x24   : > { %s411_s19 = scalar_lea.vmem %s1405_s0, %s962_s16  ;;  %s416_s15 = scalar_lea.vmem %s1406_s1, %s963_s29 }
  0x25   : > { %1027 = vmatpush3.bf16.msra.mxu0 %v1109_v1  ;;  %v1114_v3 = vld [vmem:[%s411_s19] sm:$0xff]   ;;  %v1115_v7 = vld [vmem:[%s411_s19 + $0x8] sm:$0xff]   ;;  %v1116_v8 = vld [vmem:[%s411_s19 + $0x10] sm:$0xff]   ;;  %s743_s16 = sld [smem:[#allocation2]]  ;;  %s420_s10 = scalar_lea.vmem %s1416_s11, %s963_s29 }
  0x26   : > { %1028 = vmatprep.subr.bf16.mxu0 %v1110_v2  ;;  %1036 = vmatprep.mubr.msk.bf16.mxu0 %vm533_vm0, %v1114_v3  ;;  %v1117_v9 = vld [vmem:[%s411_s19 + $0x18] sm:$0xff]   ;;  %v1118_v10 = vld [vmem:[%s411_s19 + $0x20] sm:$0xff]   ;;  %v1119_v11 = vld [vmem:[%s411_s19 + $0x28] sm:$0xff]   ;;  %s990_s21 = sld [smem:[#allocation5 + $0x1]] }
  0x27   : > { %v1120_v12 = vld [vmem:[%s411_s19 + $0x30] sm:$0xff]   ;;  %v1121_v13 = vld [vmem:[%s411_s19 + $0x38] sm:$0xff]   ;;  %s861_s19 = sld [smem:[#allocation3]] }
  0x28   : > { %s872_s22 = sld [smem:[#allocation4]] }
  0x29   : > { %1029 = vmatpush3.bf16.msra.mxu0 %v1110_v2 }
  0x2a   : > { %1030 = vmatprep.subr.bf16.mxu0 %v1111_v4 }
  0x2d   : > { %1031 = vmatpush3.bf16.msra.mxu0 %v1111_v4 }
  0x2e   : > { %1032 = vmatprep.subr.bf16.mxu0 %v1112_v5 }
  0x31   : > { %1033 = vmatpush3.bf16.msra.mxu0 %v1112_v5 }
  0x32   : > { %1034 = vmatprep.subr.bf16.mxu0 %v1113_v6 }
  0x35   : > { %1035 = vmatpush3.bf16.msra.mxu0 %v1113_v6 }
  0x38   : > { %1037 = vmatmul.mubr.msk.bf16.vlgmr.msra.gmra.mxu0 %vm533_vm0, %v1115_v7 }
  0x39   : > { %1040 = vmatprep.mubr.msk.bf16.mxu0 %vm533_vm0, %v1116_v8 }
  0x40   : > { %1041 = vmatmul.mubr.msk.bf16.gmra.mxu0 %vm533_vm0, %v1117_v9 }
  0x41   : > { %1044 = vmatprep.mubr.msk.bf16.mxu0 %vm533_vm0, %v1118_v10 }
  0x48   : > { %1045 = vmatmul.mubr.msk.bf16.gmra.mxu0 %vm533_vm0, %v1119_v11 }
  0x49   : > { %1048 = vmatprep.mubr.msk.bf16.mxu0 %vm533_vm0, %v1120_v12  ;;  %v1150_v12 = vmov 0.0  }
  0x4a   : > { %1052 = vmatprep.subr.mxu1 %v1150_v12  ;;  %1084 = vmatprep.mubr.msk.f32.mxu1 %vm1151_vm2, %v1150_v12 }
  0x50   : > { %1049 = vmatmul.mubr.msk.bf16.gmra.mxu0 %vm533_vm0, %v1121_v13 }
  0xf8   : > { %v1279_v14 = vpop.f32.mrf.mxu0 }
  0xf9   : > { %v601_v8 = vadd.f32 %v1279_v14, %v1288_v27 }
  0xfa   : > { %v1281_v15 = vpop.f32.mrf.mxu0 }
  0xfb   : > { %v593_v14 = vadd.f32 %v1288_v27, %v1281_v15 }
  0xfc   : > { %v1039_v16 = vpop.f32.mrf.mxu0 }
  0xfd   : > { %v604_v4 = vadd.f32 %v1039_v16, %v1288_v27 }
  0xfe   : > { %v1283_v17 = vpop.f32.mrf.mxu0 }
  0xff   : > { %v658_v13 = vmax.f32 %v604_v4, 0.0  ;;  %v596_v16 = vadd.f32 %v1288_v27, %v1283_v17  ;;  %v655_v17 = vmax.f32 %v593_v14, 0.0 }
 0x100   : > { %v1042_v18 = vpop.f32.mrf.mxu0 }
 0x101   : > { %v617_v56 = vadd.f32 %v1042_v18, %v1288_v27 }
 0x102   : > { %v608_v19 = vpop.f32.mrf.mxu0 }
 0x103   : > { %v661_v0 = vmax.f32 %v617_v56, 0.0  ;;  %v609_v1 = vadd.f32 %v1288_v27, %v608_v19 }
 0x104   : > { %v1043_v20 = vpop.f32.mrf.mxu0 }
 0x105   : > { %v620_v52 = vadd.f32 %v1043_v20, %v1288_v27  ;;  %v659_v9 = vmax.f32 %v609_v1, 0.0  ;;  %v684_v11 = vmul.f32 %v1298_v38, %v661_v0  ;;  %v657_v20 = vmax.f32 %v601_v8, 0.0 }
 0x106   : > { %v611_v21 = vpop.f32.mrf.mxu0 }
 0x107   : > { %v662_v60 = vmax.f32 %v620_v52, 0.0  ;;  %v612_v61 = vadd.f32 %v1288_v27, %v611_v21  ;;  %v713_v21 = vsel %vm694_vm1, %v684_v11, 0.0 }
 0x108   : > { %v1046_v22 = vpop.f32.mrf.mxu0 }
 0x109   : > { %v633_v39 = vadd.f32 %v1046_v22, %v1288_v27  ;;  %v660_v5 = vmax.f32 %v612_v61, 0.0  ;;  %v685_v7 = vmul.f32 %v1298_v38, %v662_v60  ;;  %v682_v22 = vmul.f32 %v1298_v38, %v659_v9 }
 0x10a   : > { %v624_v23 = vpop.f32.mrf.mxu0 }
 0x10b   : > { %v665_v48 = vmax.f32 %v633_v39, 0.0  ;;  %v625_v49 = vadd.f32 %v1288_v27, %v624_v23  ;;  %v716_v18 = vsel %vm694_vm1, %v685_v7, 0.0  ;;  %v683_v19 = vmul.f32 %v1298_v38, %v660_v5 }
 0x10c   : > { %v1047_v24 = vpop.f32.mrf.mxu0  ;;  %v656_v23 = vmax.f32 %v596_v16, 0.0 }
 0x10d   : > { %v636_v33 = vadd.f32 %v1047_v24, %v1288_v27  ;;  %v663_v57 = vmax.f32 %v625_v49, 0.0  ;;  %v688_v59 = vmul.f32 %v1298_v38, %v665_v48  ;;  %v710_v24 = vsel %vm694_vm1, %v683_v19, 0.0 }
 0x10e   : > { %v627_v25 = vpop.f32.mrf.mxu0 }
 0x10f   : > { %v666_v43 = vmax.f32 %v636_v33, 0.0  ;;  %v628_v44 = vadd.f32 %v1288_v27, %v627_v25  ;;  %v725_v2 = vsel %vm694_vm1, %v688_v59, 0.0  ;;  %v686_v3 = vmul.f32 %v1298_v38, %v663_v57  ;;  %v989_v33 = vld [vmem:[%s1410_s5] ss:$0 sm:$0xff] }
 0x110   : > { %v1050_v26 = vpop.f32.mrf.mxu0  ;;  %v681_v25 = vmul.f32 %v1298_v38, %v658_v13 }
 0x111   : > { %v649_v29 = vadd.f32 %v1050_v26, %v1288_v27  ;;  %v664_v53 = vmax.f32 %v628_v44, 0.0  ;;  %v689_v55 = vmul.f32 %v1298_v38, %v666_v43  ;;  %v719_v10 = vsel %vm694_vm1, %v686_v3, 0.0 }
 0x112   : > { %v640_v28 = vpop.f32.mrf.mxu0  ;;  %v707_v26 = vsel %vm694_vm1, %v682_v22, 0.0  ;;  %v704_v15 = vsel %vm694_vm1, %v681_v25, 0.0  ;;  %v777_v25 = vld [vmem:[%s1411_s6] sm:$0xff] }
 0x113   : > { %v641_v31 = vadd.f32 %v1288_v27, %v640_v28  ;;  %v669_v35 = vmax.f32 %v649_v29, 0.0  ;;  %v728_v62 = vsel %vm694_vm1, %v689_v55, 0.0  ;;  %v687_v63 = vmul.f32 %v1298_v38, %v664_v53 }
 0x114   : > { %v1051_v30 = vpop.f32.mrf.mxu0  ;;  %v680_v28 = vmul.f32 %v1298_v38, %v657_v20 }
 0x115   : > { %v652_v32 = vadd.f32 %v1051_v30, %v1288_v27  ;;  %v667_v40 = vmax.f32 %v641_v31, 0.0  ;;  %v692_v47 = vmul.f32 %v1298_v38, %v669_v35  ;;  %v722_v6 = vsel %vm694_vm1, %v687_v63, 0.0 }
 0x116   : > { %v643_v34 = vpop.f32.mrf.mxu0  ;;  %v701_v29 = vsel %vm694_vm1, %v680_v28, 0.0  ;;  %v678_v30 = vmul.f32 %v1298_v38, %v655_v17  ;;  %v862_v17 = vstv %s861_s19 }
 0x117   : > { %v670_v36 = vmax.f32 %v652_v32, 0.0  ;;  %v644_v37 = vadd.f32 %v1288_v27, %v643_v34  ;;  %v690_v51 = vmul.f32 %v1298_v38, %v667_v40  ;;  %v737_v54 = vsel %vm694_vm1, %v692_v47, 0.0  ;;  %v848_v34 = vld [vmem:[%s416_s15] sm:$0xff] }
 0x118   : > { %v679_v27 = vmul.f32 %v1298_v38, %v656_v23  ;;  %v695_v32 = vsel %vm694_vm1, %v678_v30, 0.0  ;;  %v856_v35 = vmul.f32 %v989_v33, %v848_v34  ;;  %v873_v33 = vstv %s872_s22 }
 0x119   : > { %v668_v41 = vmax.f32 %v644_v37, 0.0  ;;  %v693_v42 = vmul.f32 %v1298_v38, %v670_v36  ;;  %v731_v58 = vsel %vm694_vm1, %v690_v51, 0.0  ;;  %v1361_v37 = vstv %s743_s16 }
 0x11a   : > { %v698_v31 = vsel %vm694_vm1, %v679_v27, 0.0  ;;  %v858_v36 = vsel %vm857_vm3, %v856_v35, 0.0  ;;  %v866_v27 = vstv %s865_s20 }
 0x11b   : > { %v740_v45 = vsel %vm694_vm1, %v693_v42, 0.0  ;;  %v691_v46 = vmul.f32 %v1298_v38, %v668_v41 }
 0x11c   : > { %741 = vadd.xlane.f32.xlu0 %v740_v45 }
 0x11d   : > { %v734_v50 = vsel %vm694_vm1, %v691_v46, 0.0 }
 0x11e   : > { %735 = vadd.xlane.f32.xlu1 %v734_v50 }
 0x120   : > { %738 = vadd.xlane.f32.xlu0 %v737_v54 }
 0x122   : > { %732 = vadd.xlane.f32.xlu1 %v731_v58 }
 0x124   : > { %729 = vadd.xlane.f32.xlu0 %v728_v62 }
 0x126   : > { %726 = vadd.xlane.f32.xlu1 %v725_v2 }
 0x128   : > { %723 = vadd.xlane.f32.xlu0 %v722_v6 }
 0x12a   : > { %720 = vadd.xlane.f32.xlu1 %v719_v10 }
 0x12c   : > { %717 = vadd.xlane.f32.xlu0 %v716_v18 }
 0x12e   : > { %714 = vadd.xlane.f32.xlu1 %v713_v21 }
 0x130   : > { %711 = vadd.xlane.f32.xlu0 %v710_v24 }
 0x132   : > { %708 = vadd.xlane.f32.xlu1 %v707_v26 }
 0x134   : > { %705 = vadd.xlane.f32.xlu0 %v704_v15 }
 0x136   : > { %702 = vadd.xlane.f32.xlu1 %v701_v29  ;;  %v869_v29 = vstv %s990_s21 }
 0x138   : > { %699 = vadd.xlane.f32.xlu0 %v698_v31 }
 0x13a   : > { %696 = vadd.xlane.f32.xlu1 %v695_v32 }
 0x13c   : > { %859 = vadd.xlane.f32.xlu0 %v858_v36 }
 0x1a5   : > { %v742_v38 = vpop.xlane.xlu0 %741 }
 0x1a6   : > { %v760_v39 = vadd.f32 %v1361_v37, %v742_v38 }
 0x1a7   : > { %v736_v40 = vpop.xlane.xlu1 %735 }
 0x1a8   : > { %v776_v41 = vand.u32 2147483647, %v760_v39  ;;  %v758_v43 = vadd.f32 %v1361_v37, %v736_v40 }
 0x1a9   : > { %v739_v42 = vpop.xlane.xlu0 %738 }
 0x1aa   : > { %v759_v44 = vadd.f32 %v1361_v37, %v739_v42  ;;  %1053 = vmatpush3.msra.mxu1 %v776_v41  ;;  %v774_v49 = vand.u32 2147483647, %v758_v43 }
 0x1ab   : > { %v733_v45 = vpop.xlane.xlu1 %732  ;;  %1054 = vmatprep.subr.mxu1 %v1150_v12 }
 0x1ac   : > { %v775_v46 = vand.u32 2147483647, %v759_v44  ;;  %v757_v47 = vadd.f32 %v1361_v37, %v733_v45 }
 0x1ad   : > { %v730_v48 = vpop.xlane.xlu0 %729 }
 0x1ae   : > { %v756_v50 = vadd.f32 %v1361_v37, %v730_v48  ;;  %1055 = vmatpush3.msra.mxu1 %v775_v46  ;;  %v773_v52 = vand.u32 2147483647, %v757_v47 }
 0x1af   : > { %1056 = vmatprep.subr.mxu1 %v1150_v12  ;;  %v727_v51 = vpop.xlane.xlu1 %726 }
 0x1b0   : > { %v755_v53 = vadd.f32 %v1361_v37, %v727_v51  ;;  %1057 = vmatpush3.msra.mxu1 %v774_v49  ;;  %v772_v55 = vand.u32 2147483647, %v756_v50 }
 0x1b1   : > { %1058 = vmatprep.subr.mxu1 %v1150_v12  ;;  %v724_v54 = vpop.xlane.xlu0 %723 }
 0x1b2   : > { %v754_v56 = vadd.f32 %v1361_v37, %v724_v54  ;;  %1059 = vmatpush3.msra.mxu1 %v773_v52  ;;  %v771_v58 = vand.u32 2147483647, %v755_v53 }
 0x1b3   : > { %1060 = vmatprep.subr.mxu1 %v1150_v12  ;;  %v721_v57 = vpop.xlane.xlu1 %720 }
 0x1b4   : > { %v753_v59 = vadd.f32 %v1361_v37, %v721_v57  ;;  %1061 = vmatpush3.msra.mxu1 %v772_v55  ;;  %v770_v61 = vand.u32 2147483647, %v754_v56 }
 0x1b5   : > { %1062 = vmatprep.subr.mxu1 %v1150_v12  ;;  %v718_v60 = vpop.xlane.xlu0 %717 }
 0x1b6   : > { %v752_v62 = vadd.f32 %v1361_v37, %v718_v60  ;;  %1063 = vmatpush3.msra.mxu1 %v771_v58  ;;  %v769_v0 = vand.u32 2147483647, %v753_v59 }
 0x1b7   : > { %1064 = vmatprep.subr.mxu1 %v1150_v12  ;;  %v715_v63 = vpop.xlane.xlu1 %714 }
 0x1b8   : > { %v751_v1 = vadd.f32 %v1361_v37, %v715_v63  ;;  %1065 = vmatpush3.msra.mxu1 %v770_v61  ;;  %v768_v3 = vand.u32 2147483647, %v752_v62 }
 0x1b9   : > { %1066 = vmatprep.subr.mxu1 %v1150_v12  ;;  %v712_v2 = vpop.xlane.xlu0 %711 }
 0x1ba   : > { %v750_v4 = vadd.f32 %v1361_v37, %v712_v2  ;;  %1067 = vmatpush3.msra.mxu1 %v769_v0  ;;  %v767_v6 = vand.u32 2147483647, %v751_v1 }
 0x1bb   : > { %1068 = vmatprep.subr.mxu1 %v1150_v12  ;;  %v709_v5 = vpop.xlane.xlu1 %708 }
 0x1bc   : > { %v749_v7 = vadd.f32 %v1361_v37, %v709_v5  ;;  %1069 = vmatpush3.msra.mxu1 %v768_v3  ;;  %v766_v9 = vand.u32 2147483647, %v750_v4 }
 0x1bd   : > { %1070 = vmatprep.subr.mxu1 %v1150_v12  ;;  %v706_v8 = vpop.xlane.xlu0 %705 }
 0x1be   : > { %v748_v10 = vadd.f32 %v1361_v37, %v706_v8  ;;  %1071 = vmatpush3.msra.mxu1 %v767_v6  ;;  %v765_v13 = vand.u32 2147483647, %v749_v7 }
 0x1bf   : > { %1072 = vmatprep.subr.mxu1 %v1150_v12  ;;  %v703_v11 = vpop.xlane.xlu1 %702 }
 0x1c0   : > { %v747_v16 = vadd.f32 %v1361_v37, %v703_v11  ;;  %1073 = vmatpush3.msra.mxu1 %v766_v9  ;;  %v764_v19 = vand.u32 2147483647, %v748_v10 }
 0x1c1   : > { %1074 = vmatprep.subr.mxu1 %v1150_v12  ;;  %v700_v18 = vpop.xlane.xlu0 %699 }
 0x1c2   : > { %v746_v20 = vadd.f32 %v1361_v37, %v700_v18  ;;  %1075 = vmatpush3.msra.mxu1 %v765_v13  ;;  %v763_v21 = vand.u32 2147483647, %v747_v16 }
 0x1c3   : > { %1076 = vmatprep.subr.mxu1 %v1150_v12  ;;  %v697_v14 = vpop.xlane.xlu1 %696 }
 0x1c4   : > { %v745_v22 = vadd.f32 %v1361_v37, %v697_v14  ;;  %1077 = vmatpush3.msra.mxu1 %v764_v19  ;;  %v762_v23 = vand.u32 2147483647, %v746_v20 }
 0x1c5   : > { %1078 = vmatprep.subr.mxu1 %v1150_v12  ;;  %v860_v26 = vpop.xlane.xlu0 %859 }
 0x1c6   : > { %1079 = vmatpush3.msra.mxu1 %v763_v21  ;;  %v761_v24 = vand.u32 2147483647, %v745_v22  ;;  %v863_v28 = vadd.f32 %v862_v17, %v860_v26 }
 0x1c7   : > { %1080 = vmatprep.subr.mxu1 %v1150_v12 }
 0x1c8   : > { %1081 = vmatpush3.msra.mxu1 %v762_v23  ;;  %v864_v15 = vand.u32 2147483647, %v863_v28 }
 0x1c9   : > { %1082 = vmatprep.subr.mxu1 %v1150_v12 }
 0x1ca   : > { %1083 = vmatpush3.msra.mxu1 %v761_v24  ;;  %v867_v30 = vmul.f32 %v866_v27, %v864_v15 }
 0x1cb   : > { %1085 = vmatmul.mubr.f32.vlgmr.msra.gmra.mxu1 %v777_v25 }
 0x28b   : > { %v844_v31 = vpop.f32.mrf.mxu1 }
 0x28c   : > { %v870_v32 = vmul.f32 %v869_v29, %v844_v31 }
 0x28d   : > { %v1086_v34 = vpop.f32.mrf.mxu1 }
 0x28e   : > { %v871_v35 = vadd.f32 %v870_v32, %v867_v30 }
 0x290   : > { %v874_v12 = vadd.f32 %v873_v33, %v871_v35 }
 0x292   : > { %876 = vst.msk [vmem:[%s420_s10] sm:$0xff] %vm875_vm4, %v874_v12 }
 0x293 PF: > { %s25_s23 = sadd.s32 1, %s1147_s23  }
 0x294   : > { %p22_p2 = scmp.ge.s32.totalorder %s25_s23, 4  }
 0x296   :  { %24 = sbr.rel (!%p22_p2) target bundleno = 5 (0x5), region = 102 }
 0x29b   :  { %896 = vsyncpa [#allocation6], 1 }
 0x29c   :  { %898 = vsyncpa [#allocation6 + $0x1], 1 }

</bundles_post_ra>
